<compile_context>
chip_gen: v6e
topology: v6e:2x2x1
jax: 0.10.0
libtpu: 0.0.40
codegen_flags: <defaults>
</compile_context>

<pallas_src>
import functools

import jax
import jax.numpy as jnp
from jax import lax
from jax.experimental import pallas as pl
from jax.experimental.pallas import tpu as pltpu


def _round_up(x, m):
    return (x + m - 1) // m * m


def _vmem_capacity_bytes():
    try:
        cap = getattr(pltpu.get_tpu_info(), "vmem_capacity_bytes", None)
        if cap:
            return int(cap)
    except Exception:
        pass
    return 64 << 20  # conservative fallback (v7x per-TensorCore VMEM)


def _resident_spec(block_shape):
    """BlockSpec for a grid-invariant operand; single-buffer when supported."""
    try:
        return (pl.BlockSpec(block_shape, lambda i: (0, 0),
                             pipeline_mode=pl.Buffered(1)), 1)
    except Exception:
        return pl.BlockSpec(block_shape, lambda i: (0, 0)), 2


def film_kernel(x_ref, c_ref, w_ref, b_ref, o_ref, *, split, mxu_dtype):
    # x_ref, c_ref, o_ref: (tm, Dp); w_ref: (2*Dp, Dp) in nn.Linear [out, in]
    # layout; b_ref: (1, 2*Dp) float32.
    c = c_ref[...]
    if c.dtype != mxu_dtype:
        c = c.astype(mxu_dtype)
    # Contract conditioning's feature dim with the weight's `in` dim directly
    # (c @ W.T): no transpose materialization, f32 MXU accumulation.
    dn = (((1,), (1,)), ((), ()))
    y = lax.dot_general(c, w_ref[...], dn, preferred_element_type=jnp.float32)
    y = y + b_ref[...]
    gamma = y[:, :split]          # split is a multiple of 128 -> aligned slice
    beta = y[:, split:]
    x = x_ref[...].astype(jnp.float32)
    # FMA in f32, single downcast at the store.
    o_ref[...] = (gamma * x + beta).astype(o_ref.dtype)


@functools.partial(jax.jit, static_argnames=("tm", "prefer_bf16_matmul"))
def film(x, conditioning, weight, bias, *, tm=None, prefer_bf16_matmul=None):
    """FiLM forward.

    x:            [B, T, D]
    conditioning: [B, T, D]
    weight:       [2D, D]   (PyTorch nn.Linear layout: [out, in])
    bias:         [2D]
    returns:      [B, T, D]
    """
    B, T, D = x.shape
    M = B * T
    Dp = _round_up(D, 128)        # lane-dense feature dim

    # MXU operand dtype: keep low-precision inputs as-is; for f32 inputs use
    # bf16 only when D is large enough to be compute/VMEM relevant.
    low_p = (jnp.dtype(conditioning.dtype) == jnp.bfloat16
             or jnp.dtype(weight.dtype) == jnp.bfloat16)
    if prefer_bf16_matmul is None:
        use_bf16 = low_p or D >= 1024
    else:
        use_bf16 = low_p or bool(prefer_bf16_matmul)
    mxu_dtype = jnp.bfloat16 if use_bf16 else jnp.float32

    x2 = x.reshape(M, D)
    c2 = conditioning.reshape(M, D)
    if Dp != D:
        # Rare path (D % 128 != 0): pad feature axis only. Zero-padded weight
        # `in` columns keep the padded conditioning columns inert.
        pf = Dp - D
        x2 = jnp.pad(x2, ((0, 0), (0, pf)))
        c2 = jnp.pad(c2, ((0, 0), (0, pf)))
        w_f = jnp.concatenate(
            [jnp.pad(weight[:D], ((0, pf), (0, pf))),
             jnp.pad(weight[D:], ((0, pf), (0, pf)))], axis=0)
        b_f = jnp.concatenate(
            [jnp.pad(bias[:D], (0, pf)), jnp.pad(bias[D:], (0, pf))])
    else:
        w_f = weight
        b_f = bias
    w_f = w_f.astype(mxu_dtype)                       # (2*Dp, Dp), [out, in]
    b_f = b_f.astype(jnp.float32).reshape(1, 2 * Dp)

    # Grid-invariant operands: resident, single-buffered.
    w_spec, n_wbuf = _resident_spec((2 * Dp, Dp))
    b_spec, _ = _resident_spec((1, 2 * Dp))

    # ---- VMEM budget & adaptive row tile --------------------------------
    io_item = jnp.dtype(x.dtype).itemsize
    c_item = jnp.dtype(conditioning.dtype).itemsize
    w_item = jnp.dtype(mxu_dtype).itemsize

    vmem_cap = _vmem_capacity_bytes()
    vmem_limit = max(32 << 20, (vmem_cap * 13) // 16)   # ~104 MiB (v5e/v6e), ~52 MiB (v7x)

    resident = n_wbuf * (2 * Dp * Dp * w_item + 2 * Dp * 4)
    io_per_row = Dp * (2 * io_item + c_item)            # x + out + conditioning
    vmem_per_row = 2 * io_per_row + 20 * Dp             # double-buffered tiles + f32 temporaries
    tiles_budget = vmem_limit - resident - (4 << 20)

    if tm is None:
        tm = (8 << 20) // io_per_row                    # ~8 MiB HBM traffic per grid step
    tm = min(int(tm), max(8, tiles_budget // vmem_per_row), 4096, _round_up(M, 8))
    tm = max(8, (tm // 8) * 8)
    # TODO(synk): if the fused weight itself exceeds the VMEM budget (very
    # large d_model on v7x), add a K grid axis ("arbitrary") with an f32
    # accumulator instead of keeping the whole weight resident.

    cost = pl.CostEstimate(
        flops=4 * M * D * D + 2 * M * D,
        transcendentals=0,
        bytes_accessed=(2 * io_item + c_item) * M * D
                       + 2 * D * D * w_item + 2 * D * 4,
    )

    grid = (pl.cdiv(M, tm),)
    kern = functools.partial(film_kernel, split=Dp, mxu_dtype=mxu_dtype)

    out = pl.pallas_call(
        kern,
        out_shape=jax.ShapeDtypeStruct((M, Dp), x.dtype),
        grid_spec=pltpu.PrefetchScalarGridSpec(
            num_scalar_prefetch=0,
            grid=grid,
            in_specs=[
                pl.BlockSpec((tm, Dp), lambda i: (i, 0)),   # x rows
                pl.BlockSpec((tm, Dp), lambda i: (i, 0)),   # conditioning rows
                w_spec,                                     # fused W (resident)
                b_spec,                                     # fused bias (resident)
            ],
            out_specs=pl.BlockSpec((tm, Dp), lambda i: (i, 0)),
        ),
        compiler_params=pltpu.CompilerParams(
            dimension_semantics=("parallel",),
            vmem_limit_bytes=int(vmem_limit),
        ),
        cost_estimate=cost,
    )(x2, c2, w_f, b_f)

    if Dp != D:
        out = out[:, :D]
    return out.reshape(B, T, D)


def film_ref(x, conditioning, weight, bias):
    y = conditioning @ weight.T + bias
    d = x.shape[-1]
    gamma, beta = y[..., :d], y[..., d:]
    return gamma * x + beta


if __name__ == "__main__":
    B, T, D = 2, 8, 32
    key = jax.random.PRNGKey(0)
    kx, kc, kw, kb = jax.random.split(key, 4)

    x = jax.random.normal(kx, (B, T, D), dtype=jnp.float32)
    cond = jax.random.normal(kc, (B, T, D), dtype=jnp.float32)
    # nn.Linear(d_model, 2*d_model): weight [2D, D], bias [2D]
    weight = jax.random.normal(kw, (2 * D, D), dtype=jnp.float32) * 0.05
    bias = jax.random.normal(kb, (2 * D,), dtype=jnp.float32) * 0.05

    out = jax.block_until_ready(film(x, cond, weight, bias))
    ref = film_ref(x, cond, weight, bias)

    assert out.shape == (B, T, D)
    # Tolerance covers MXU matmul precision differences vs the XLA reference.
    assert jnp.allclose(out, ref, atol=1e-2, rtol=1e-2), \
        float(jnp.max(jnp.abs(out - ref)))

    print("KERNEL_OK")
</pallas_src>

<mosaic_0001>
module attributes {stable_mosaic.version = 11 : i64} {
  func.func @film_kernel(%arg0: i32, %arg1: memref<16x128xf32, #tpu.memory_space<vmem>>, %arg2: memref<16x128xf32, #tpu.memory_space<vmem>>, %arg3: memref<256x128xf32, #tpu.memory_space<vmem>>, %arg4: memref<1x256xf32, #tpu.memory_space<vmem>>, %arg5: memref<16x128xf32, #tpu.memory_space<vmem>>) attributes {dimension_semantics = [#tpu.dimension_semantics<parallel>], iteration_bounds = array<i64: 1>, scalar_prefetch = 0 : i64, scratch_operands = 0 : i64, tpu.core_type = #tpu.core_type<tc>, window_params = [{transform_indices = @transform_0, window_bounds = array<i64: 16, 128>}, {transform_indices = @transform_1, window_bounds = array<i64: 16, 128>}, {pipeline_mode = #tpu.pipeline_mode<synchronous>, transform_indices = @transform_2, window_bounds = array<i64: 256, 128>}, {pipeline_mode = #tpu.pipeline_mode<synchronous>, transform_indices = @transform_3, window_bounds = array<i64: 1, 256>}, {transform_indices = @transform_4, window_bounds = array<i64: 16, 128>}]} {
    %c0 = arith.constant 0 : index
    %c0_0 = arith.constant 0 : index
    %0 = vector.load %arg2[%c0, %c0_0] : memref<16x128xf32, #tpu.memory_space<vmem>>, vector<16x128xf32>
    %c0_1 = arith.constant 0 : index
    %c0_2 = arith.constant 0 : index
    %1 = vector.load %arg3[%c0_1, %c0_2] : memref<256x128xf32, #tpu.memory_space<vmem>>, vector<256x128xf32>
    %cst = arith.constant dense<0.000000e+00> : vector<16x256xf32>
    %2 = tpu.matmul %0, %1, %cst {dimension_numbers = #tpu.dot_dimension_numbers<[1], [1], [0], [0], [0, 0, 1, 0], [], []>} : vector<16x128xf32>, vector<256x128xf32>, vector<16x256xf32> -> vector<16x256xf32>
    %c0_3 = arith.constant 0 : index
    %c0_4 = arith.constant 0 : index
    %3 = vector.load %arg4[%c0_3, %c0_4] : memref<1x256xf32, #tpu.memory_space<vmem>>, vector<1x256xf32>
    %4 = vector.broadcast %3 : vector<1x256xf32> to vector<16x256xf32>
    %5 = arith.addf %2, %4 : vector<16x256xf32>
    %6 = vector.extract_strided_slice %5 {offsets = [0, 0], sizes = [16, 128], strides = [1, 1]} : vector<16x256xf32> to vector<16x128xf32>
    %7 = vector.extract_strided_slice %5 {offsets = [0, 128], sizes = [16, 128], strides = [1, 1]} : vector<16x256xf32> to vector<16x128xf32>
    %c0_5 = arith.constant 0 : index
    %c0_6 = arith.constant 0 : index
    %8 = vector.load %arg1[%c0_5, %c0_6] : memref<16x128xf32, #tpu.memory_space<vmem>>, vector<16x128xf32>
    %9 = arith.mulf %6, %8 : vector<16x128xf32>
    %10 = arith.addf %9, %7 : vector<16x128xf32>
    %c0_7 = arith.constant 0 : index
    %c0_8 = arith.constant 0 : index
    %11 = vector.load %arg5[%c0_7, %c0_8] : memref<16x128xf32, #tpu.memory_space<vmem>>, vector<16x128xf32>
    tpu.vector_store %arg5[%c0_7, %c0_8], %10 {strides = array<i32>} : memref<16x128xf32, #tpu.memory_space<vmem>>, vector<16x128xf32>,
    return
  }
  func.func @transform_0(%arg0: i32) -> (i32, i32) {
    %c0_i32 = arith.constant 0 : i32
    %c0_i32_0 = arith.constant 0 : i32
    return %arg0, %c0_i32 : i32, i32
  }
  func.func @transform_1(%arg0: i32) -> (i32, i32) {
    %c0_i32 = arith.constant 0 : i32
    %c0_i32_0 = arith.constant 0 : i32
    return %arg0, %c0_i32 : i32, i32
  }
  func.func @transform_2(%arg0: i32) -> (i32, i32) {
    %c0_i32 = arith.constant 0 : i32
    %c0_i32_0 = arith.constant 0 : i32
    %c0_i32_1 = arith.constant 0 : i32
    return %c0_i32, %c0_i32_0 : i32, i32
  }
  func.func @transform_3(%arg0: i32) -> (i32, i32) {
    %c0_i32 = arith.constant 0 : i32
    %c0_i32_0 = arith.constant 0 : i32
    %c0_i32_1 = arith.constant 0 : i32
    return %c0_i32, %c0_i32_0 : i32, i32
  }
  func.func @transform_4(%arg0: i32) -> (i32, i32) {
    %c0_i32 = arith.constant 0 : i32
    %c0_i32_0 = arith.constant 0 : i32
    return %arg0, %c0_i32 : i32, i32
  }
}

</mosaic_0001>

<bundles_post_ra>
// kernel: film.1
= control target key start
LH: loop header
LB: loop body
LE: loop exit
PB: predicated region body
PF: predicated region fallthrough
CT: control target
= control target key end

     0   :  { %v53_v34 = vlaneseq  ;;  %s370_s2 = inlined_call_operand.vmem [shape: f32[256,128], index: 2, kind: input, shape index: {}]   ;;  %s371_s1 = inlined_call_operand.vmem [shape: f32[16,128], index: 1, kind: input, shape index: {}]   ;;  %s372_s3 = inlined_call_operand.vmem [shape: f32[1,256], index: 3, kind: input, shape index: {}]   ;;  %s373_s0 = inlined_call_operand.vmem [shape: f32[16,128], index: 0, kind: input, shape index: {}]   ;;  %s374_s4 = inlined_call_operand.vmem [shape: f32[16,128], index: 4, kind: output, shape index: {}]  }
   0x1   :  { %v50_v0 = vld [vmem:[%s370_s2 + $0xf8] sm:$0xff]  ;;  %v49_v2 = vld [vmem:[%s370_s2 + $0xf0] sm:$0xff]  ;;  %v48_v4 = vld [vmem:[%s370_s2 + $0xe8] sm:$0xff] }
   0x2   :  { %v34_v1 = vld [vmem:[%s370_s2 + $0x78] sm:$0xff]  ;;  %152 = vmatprep.subr.mxu0 %v50_v0  ;;  %188 = vmatprep.subr.mxu1 %v50_v0  ;;  %v33_v3 = vld [vmem:[%s370_s2 + $0x70] sm:$0xff]  ;;  %v32_v5 = vld [vmem:[%s370_s2 + $0x68] sm:$0xff]  ;;  %v54_v35 = vshrl.u32 %v53_v34, 7 }
   0x3   :  { %153 = vmatpush3.xpose.msra.mxu0 %v34_v1  ;;  %204 = vmatpush3.xpose.msra.mxu1 %v34_v1  ;;  %v47_v6 = vld [vmem:[%s370_s2 + $0xe0] sm:$0xff]  ;;  %v277_v9 = vld [vmem:[%s371_s1 + $0x8] sm:$0xff]  ;;  %v46_v10 = vld [vmem:[%s370_s2 + $0xd8] sm:$0xff] }
   0x4   :  { %154 = vmatprep.subr.mxu0 %v49_v2  ;;  %189 = vmatprep.subr.mxu1 %v49_v2  ;;  %v269_v7 = vld [vmem:[%s371_s1] sm:$0xff]  ;;  %v30_v11 = vld [vmem:[%s370_s2 + $0x58] sm:$0xff]  ;;  %v45_v12 = vld [vmem:[%s370_s2 + $0xd0] sm:$0xff]  ;;  %v55_v36 = vsub.s32 0, %v54_v35  ;;  %v59_v38 = vsub.s32 1, %v54_v35 }
   0x5   :  { %v31_v8 = vld [vmem:[%s370_s2 + $0x60] sm:$0xff]  ;;  %184 = vmatprep.mubr.f32.mxu0 %v269_v7  ;;  %186 = vmatprep.mubr.f32.mxu1 %v277_v9  ;;  %v29_v13 = vld [vmem:[%s370_s2 + $0x50] sm:$0xff]  ;;  %v44_v14 = vld [vmem:[%s370_s2 + $0xc8] sm:$0xff] }
   0x6   :  { %v28_v15 = vld [vmem:[%s370_s2 + $0x48] sm:$0xff]  ;;  %v43_v16 = vld [vmem:[%s370_s2 + $0xc0] sm:$0xff]  ;;  %v42_v18 = vld [vmem:[%s370_s2 + $0xb8] sm:$0xff] }
   0x7   :  { %155 = vmatpush3.xpose.msra.mxu0 %v33_v3  ;;  %205 = vmatpush3.xpose.msra.mxu1 %v33_v3  ;;  %v27_v17 = vld [vmem:[%s370_s2 + $0x40] sm:$0xff]  ;;  %v26_v19 = vld [vmem:[%s370_s2 + $0x38] sm:$0xff]  ;;  %v41_v20 = vld [vmem:[%s370_s2 + $0xb0] sm:$0xff] }
   0x8   :  { %156 = vmatprep.subr.mxu0 %v48_v4  ;;  %190 = vmatprep.subr.mxu1 %v48_v4  ;;  %v25_v21 = vld [vmem:[%s370_s2 + $0x30] sm:$0xff]  ;;  %v40_v22 = vld [vmem:[%s370_s2 + $0xa8] sm:$0xff]  ;;  %v39_v24 = vld [vmem:[%s370_s2 + $0xa0] sm:$0xff] }
   0x9   :  { %v24_v23 = vld [vmem:[%s370_s2 + $0x28] sm:$0xff]  ;;  %v23_v25 = vld [vmem:[%s370_s2 + $0x20] sm:$0xff]  ;;  %v38_v26 = vld [vmem:[%s370_s2 + $0x98] sm:$0xff] }
   0xa   :  { %v22_v27 = vld [vmem:[%s370_s2 + $0x18] sm:$0xff]  ;;  %v37_v28 = vld [vmem:[%s370_s2 + $0x90] sm:$0xff]  ;;  %v36_v30 = vld [vmem:[%s370_s2 + $0x88] sm:$0xff] }
   0xb   :  { %157 = vmatpush3.xpose.msra.mxu0 %v32_v5  ;;  %206 = vmatpush3.xpose.msra.mxu1 %v32_v5  ;;  %v21_v29 = vld [vmem:[%s370_s2 + $0x10] sm:$0xff]  ;;  %v20_v31 = vld [vmem:[%s370_s2 + $0x8] sm:$0xff]  ;;  %v35_v32 = vld [vmem:[%s370_s2 + $0x80] sm:$0xff] }
   0xc   :  { %158 = vmatprep.subr.mxu0 %v47_v6  ;;  %191 = vmatprep.subr.mxu1 %v47_v6  ;;  %v19_v33 = vld [vmem:[%s370_s2] sm:$0xff]  ;;  %v141_v44 = vld [vmem:[%s373_s0 + $0x8] sm:$0xff] }
   0xd   :  { %v51_v37 = vld [vmem:[%s372_s3] sm:$0x3] }
   0xe   :  { %v56_v39 = vrot.slane %v51_v37, %v55_v36  ;;  %v60_v40 = vrot.slane %v51_v37, %v59_v38  ;;  %v140_v42 = vld [vmem:[%s373_s0] sm:$0xff] }
   0xf   :  { %159 = vmatpush3.xpose.msra.mxu0 %v31_v8  ;;  %207 = vmatpush3.xpose.msra.mxu1 %v31_v8 }
  0x10   :  { %160 = vmatprep.subr.mxu0 %v46_v10  ;;  %192 = vmatprep.subr.mxu1 %v46_v10 }
  0x13   :  { %161 = vmatpush3.xpose.msra.mxu0 %v30_v11  ;;  %208 = vmatpush3.xpose.msra.mxu1 %v30_v11 }
  0x14   :  { %162 = vmatprep.subr.mxu0 %v45_v12  ;;  %193 = vmatprep.subr.mxu1 %v45_v12 }
  0x17   :  { %163 = vmatpush3.xpose.msra.mxu0 %v29_v13  ;;  %209 = vmatpush3.xpose.msra.mxu1 %v29_v13 }
  0x18   :  { %164 = vmatprep.subr.mxu0 %v44_v14  ;;  %194 = vmatprep.subr.mxu1 %v44_v14 }
  0x1b   :  { %165 = vmatpush3.xpose.msra.mxu0 %v28_v15  ;;  %210 = vmatpush3.xpose.msra.mxu1 %v28_v15 }
  0x1c   :  { %166 = vmatprep.subr.mxu0 %v43_v16  ;;  %195 = vmatprep.subr.mxu1 %v43_v16 }
  0x1f   :  { %167 = vmatpush3.xpose.msra.mxu0 %v27_v17  ;;  %211 = vmatpush3.xpose.msra.mxu1 %v27_v17 }
  0x20   :  { %168 = vmatprep.subr.mxu0 %v42_v18  ;;  %196 = vmatprep.subr.mxu1 %v42_v18 }
  0x23   :  { %169 = vmatpush3.xpose.msra.mxu0 %v26_v19  ;;  %212 = vmatpush3.xpose.msra.mxu1 %v26_v19 }
  0x24   :  { %170 = vmatprep.subr.mxu0 %v41_v20  ;;  %197 = vmatprep.subr.mxu1 %v41_v20 }
  0x27   :  { %171 = vmatpush3.xpose.msra.mxu0 %v25_v21  ;;  %213 = vmatpush3.xpose.msra.mxu1 %v25_v21 }
  0x28   :  { %172 = vmatprep.subr.mxu0 %v40_v22  ;;  %198 = vmatprep.subr.mxu1 %v40_v22 }
  0x2b   :  { %173 = vmatpush3.xpose.msra.mxu0 %v24_v23  ;;  %214 = vmatpush3.xpose.msra.mxu1 %v24_v23 }
  0x2c   :  { %174 = vmatprep.subr.mxu0 %v39_v24  ;;  %199 = vmatprep.subr.mxu1 %v39_v24 }
  0x2f   :  { %175 = vmatpush3.xpose.msra.mxu0 %v23_v25  ;;  %215 = vmatpush3.xpose.msra.mxu1 %v23_v25 }
  0x30   :  { %176 = vmatprep.subr.mxu0 %v38_v26  ;;  %200 = vmatprep.subr.mxu1 %v38_v26 }
  0x33   :  { %177 = vmatpush3.xpose.msra.mxu0 %v22_v27  ;;  %216 = vmatpush3.xpose.msra.mxu1 %v22_v27 }
  0x34   :  { %178 = vmatprep.subr.mxu0 %v37_v28  ;;  %201 = vmatprep.subr.mxu1 %v37_v28 }
  0x37   :  { %179 = vmatpush3.xpose.msra.mxu0 %v21_v29  ;;  %217 = vmatpush3.xpose.msra.mxu1 %v21_v29 }
  0x38   :  { %180 = vmatprep.subr.mxu0 %v36_v30  ;;  %202 = vmatprep.subr.mxu1 %v36_v30 }
  0x3b   :  { %181 = vmatpush3.xpose.msra.mxu0 %v20_v31  ;;  %218 = vmatpush3.xpose.msra.mxu1 %v20_v31 }
  0x3c   :  { %182 = vmatprep.subr.mxu0 %v35_v32  ;;  %203 = vmatprep.subr.mxu1 %v35_v32 }
  0x3f   :  { %183 = vmatpush3.xpose.msra.mxu0 %v19_v33  ;;  %219 = vmatpush3.xpose.msra.mxu1 %v19_v33 }
  0x42   :  { %185 = vmatmul.mubr.f32.vlgmr.msra.gmra.mxu0 %v269_v7  ;;  %187 = vmatmul.mubr.f32.vlgmr.msra.gmra.mxu1 %v277_v9 }
 0x102   :  { %v129_v41 = vpop.f32.mrf.mxu0  ;;  %v135_v43 = vpop.f32.mrf.mxu1 }
 0x103   :  { %v130_v45 = vadd.f32 %v129_v41, %v56_v39  ;;  %v136_v46 = vadd.f32 %v135_v43, %v56_v39 }
 0x104   :  { %v131_v47 = vpop.f32.mrf.mxu0  ;;  %v137_v48 = vpop.f32.mrf.mxu1 }
 0x105   :  { %v142_v49 = vmul.f32 %v140_v42, %v130_v45  ;;  %v143_v50 = vmul.f32 %v141_v44, %v136_v46  ;;  %v132_v51 = vadd.f32 %v131_v47, %v60_v40  ;;  %v138_v52 = vadd.f32 %v137_v48, %v60_v40 }
 0x107   :  { %v144_v53 = vadd.f32 %v142_v49, %v132_v51  ;;  %v145_v54 = vadd.f32 %v143_v50, %v138_v52 }
 0x109   :  { %146 = vst [vmem:[%s374_s4] sm:$0xff] %v144_v53  ;;  %147 = vst [vmem:[%s374_s4 + $0x8] sm:$0xff] %v145_v54 }

</bundles_post_ra>
